<compile_context>
chip_gen: v7x
topology: tpu7x:2x2x1
jax: 0.10.0
libtpu: 0.0.40
codegen_flags: <defaults>
</compile_context>

<pallas_src>
import functools

import jax
import jax.numpy as jnp
from jax.experimental import pallas as pl
from jax.experimental.pallas import tpu as pltpu

_LANE = 128
_SUBLANE = 8


def _round_up(x: int, m: int) -> int:
    return ((x + m - 1) // m) * m


def _fcnn_kernel(*refs, n_layers: int, neg_slope: float, use_bf16_matmul: bool):
    """refs = (x_ref, w0, b0, w1, b1, ..., w_{L-1}, b_{L-1}, out_ref)."""
    x_ref = refs[0]
    out_ref = refs[-1]
    param_refs = refs[1:-1]
    assert len(param_refs) == 2 * n_layers

    h = x_ref[...]  # f32 activation tile (TB, pdims[0])
    for layer in range(n_layers):
        w_ref = param_refs[2 * layer]
        b_ref = param_refs[2 * layer + 1]
        lhs = h.astype(jnp.bfloat16) if use_bf16_matmul else h
        # MXU matmul with f32 accumulation; bias add broadcasts the (1, dout) row.
        h = jnp.dot(lhs, w_ref[...], preferred_element_type=jnp.float32) + b_ref[...]
        if layer < n_layers - 1:
            # LeakyReLU: single select on the VPU, stays f32.
            h = jnp.where(h > 0, h, neg_slope * h)
        else:
            # Sigmoid: exp (EUP) + approximate reciprocal (EUP) -> no VALU divide.
            h = pl.reciprocal(1.0 + jnp.exp(-h), approx=True)
    out_ref[...] = h.astype(out_ref.dtype)


def fcnn_forward(x, weights, biases, neg_slope: float, *,
                 use_bf16_matmul: bool = False, batch_tile: int = 1024):
    """Run the FCNN forward pass in a single Pallas kernel call.

    x       : [B, size_in] float32
    weights : list of [in_i, out_i] float32 arrays
    biases  : list of [out_i] (or [1, out_i]) float32 arrays
    """
    n_layers = len(weights)
    assert len(biases) == n_layers
    B, size_in = x.shape
    size_out = weights[-1].shape[1]

    # ---- Lane-pad all feature widths to multiples of 128 (zero padding is inert). ----
    dims = [size_in] + [w.shape[1] for w in weights]
    pdims = [_round_up(d, _LANE) for d in dims]

    w_dtype = jnp.bfloat16 if use_bf16_matmul else jnp.float32
    padded_params = []
    for layer, (w, b) in enumerate(zip(weights, biases)):
        din, dout = w.shape
        pin, pout = pdims[layer], pdims[layer + 1]
        w = w.astype(w_dtype)
        if (pin, pout) != (din, dout):
            w = jnp.pad(w, ((0, pin - din), (0, pout - dout)))
        b = jnp.reshape(b, (1, -1)).astype(jnp.float32)
        if pout != dout:
            b = jnp.pad(b, ((0, 0), (0, pout - dout)))
        padded_params.append(w)
        padded_params.append(b)

    # ---- Tile the batch; pad rows so the tile divides evenly (padded rows are inert). ----
    TB = max(_SUBLANE, min(_round_up(batch_tile, _SUBLANE), _round_up(B, _SUBLANE)))
    Bp = _round_up(B, TB)
    xp = x.astype(jnp.float32)
    if (Bp, pdims[0]) != (B, size_in):
        xp = jnp.pad(xp, ((0, Bp - B), (0, pdims[0] - size_in)))

    grid = (Bp // TB,)
    inputs = [xp] + padded_params

    in_specs = [pl.BlockSpec((TB, pdims[0]), lambda i: (i, 0))]
    for p in padded_params:
        # Same block every grid step -> stays VMEM-resident, no re-DMA.
        in_specs.append(pl.BlockSpec(p.shape, lambda i: (0, 0)))
    out_spec = pl.BlockSpec((TB, pdims[-1]), lambda i: (i, 0))

    # ---- Cost estimate (helps XLA schedule around the custom call). ----
    flops = 2 * Bp * sum(pdims[i] * pdims[i + 1] for i in range(n_layers))
    transcendentals = 2 * Bp * pdims[-1]  # exp + reciprocal on the last layer
    bytes_accessed = (
        int(xp.size) * xp.dtype.itemsize
        + sum(int(p.size) * p.dtype.itemsize for p in padded_params)
        + Bp * pdims[-1] * 4
    )
    cost = pl.CostEstimate(
        flops=flops, transcendentals=transcendentals, bytes_accessed=bytes_accessed
    )

    # ---- VMEM budget: params (double-buffered by default) + activation tiles + slack.
    #      Capped at 48 MiB so it is always safe on v7x's 64 MiB VMEM. ----
    param_bytes = 2 * sum(int(p.size) * p.dtype.itemsize for p in padded_params)
    act_bytes = 4 * TB * max(pdims) * 4
    vmem_limit = min(max(param_bytes + act_bytes + (4 << 20), 8 << 20), 48 << 20)

    kernel = functools.partial(
        _fcnn_kernel,
        n_layers=n_layers,
        neg_slope=float(neg_slope),
        use_bf16_matmul=use_bf16_matmul,
    )

    out_full = pl.pallas_call(
        kernel,
        grid=grid,
        in_specs=in_specs,
        out_specs=out_spec,
        out_shape=jax.ShapeDtypeStruct((Bp, pdims[-1]), jnp.float32),
        compiler_params=pltpu.CompilerParams(
            dimension_semantics=("parallel",),
            vmem_limit_bytes=int(vmem_limit),
        ),
        cost_estimate=cost,
    )(*inputs)

    return out_full[:B, :size_out]


def init_fcnn_params(key, size_in, size_out, n_layers, n_node_hidden,
                     weight_init_std):
    """Deterministic parameter init mirroring init_weights_normalized_normal:
    weight ~ Normal(0, weight_init_std / in_features), bias = 0."""
    dims = [size_in] + [n_node_hidden] * (n_layers - 1) + [size_out]
    weights, biases = [], []
    for i in range(n_layers):
        fan_in, fan_out = dims[i], dims[i + 1]
        key, sub = jax.random.split(key)
        std = weight_init_std / fan_in
        w = std * jax.random.normal(sub, (fan_in, fan_out), dtype=jnp.float32)
        b = jnp.zeros((fan_out,), dtype=jnp.float32)
        weights.append(w)
        biases.append(b)
    return weights, biases


def fcnn_reference(x, weights, biases, neg_slope):
    """Pure-JAX reference for correctness checking."""
    h = x
    n = len(weights)
    for i, (w, b) in enumerate(zip(weights, biases)):
        h = h @ w + jnp.reshape(b, (1, -1))
        if i < n - 1:
            h = jnp.where(h > 0, h, neg_slope * h)
        else:
            h = jax.nn.sigmoid(h)
    return h


if __name__ == "__main__":
    # Small synthetic configuration consistent with FCNN.__init__.
    LReLu_neg_slope = 0.1
    weight_init_std = 1.0
    size_in = 16
    size_out = 8
    N_layers = 4          # lin_first + 2 middle layers + lin_last
    N_node_hidden = 32
    batch = 64            # multiple batch tiles to exercise the pipelined grid

    key = jax.random.PRNGKey(0)
    key, xkey = jax.random.split(key)
    x = jax.random.normal(xkey, (batch, size_in), dtype=jnp.float32)

    weights, biases = init_fcnn_params(
        key, size_in, size_out, N_layers, N_node_hidden, weight_init_std
    )

    ref = fcnn_reference(x, weights, biases, LReLu_neg_slope)

    # f32 matmul path (bit-faithful to the PyTorch module up to approx-reciprocal).
    out = fcnn_forward(x, weights, biases, LReLu_neg_slope, batch_tile=32)
    out = jax.block_until_ready(out)
    assert out.shape == (batch, size_out)
    assert jnp.allclose(out, ref, atol=2e-3, rtol=0), "f32 path mismatch vs reference"

    # bf16-matmul path (v6e/v5e MXU feed; f32 accumulate + f32 elementwise).
    out_bf16 = fcnn_forward(
        x, weights, biases, LReLu_neg_slope, use_bf16_matmul=True, batch_tile=32
    )
    out_bf16 = jax.block_until_ready(out_bf16)
    assert out_bf16.shape == (batch, size_out)
    assert jnp.allclose(out_bf16, ref, atol=3e-2, rtol=0), "bf16 path mismatch vs reference"

    print("KERNEL_OK")
</pallas_src>

<mosaic_0001>
module attributes {stable_mosaic.version = 11 : i64} {
  func.func @_fcnn_kernel(%arg0: i32, %arg1: memref<32x128xf32, #tpu.memory_space<vmem>>, %arg2: memref<128x128xf32, #tpu.memory_space<vmem>>, %arg3: memref<1x128xf32, #tpu.memory_space<vmem>>, %arg4: memref<128x128xf32, #tpu.memory_space<vmem>>, %arg5: memref<1x128xf32, #tpu.memory_space<vmem>>, %arg6: memref<128x128xf32, #tpu.memory_space<vmem>>, %arg7: memref<1x128xf32, #tpu.memory_space<vmem>>, %arg8: memref<128x128xf32, #tpu.memory_space<vmem>>, %arg9: memref<1x128xf32, #tpu.memory_space<vmem>>, %arg10: memref<32x128xf32, #tpu.memory_space<vmem>>) attributes {dimension_semantics = [#tpu.dimension_semantics<parallel>], iteration_bounds = array<i64: 2>, scalar_prefetch = 0 : i64, scratch_operands = 0 : i64, tpu.core_type = #tpu.core_type<tc>, window_params = [{transform_indices = @transform_0, window_bounds = array<i64: 32, 128>}, {pipeline_mode = #tpu.pipeline_mode<synchronous>, transform_indices = @transform_1, window_bounds = array<i64: 128, 128>}, {pipeline_mode = #tpu.pipeline_mode<synchronous>, transform_indices = @transform_2, window_bounds = array<i64: 1, 128>}, {pipeline_mode = #tpu.pipeline_mode<synchronous>, transform_indices = @transform_3, window_bounds = array<i64: 128, 128>}, {pipeline_mode = #tpu.pipeline_mode<synchronous>, transform_indices = @transform_4, window_bounds = array<i64: 1, 128>}, {pipeline_mode = #tpu.pipeline_mode<synchronous>, transform_indices = @transform_5, window_bounds = array<i64: 128, 128>}, {pipeline_mode = #tpu.pipeline_mode<synchronous>, transform_indices = @transform_6, window_bounds = array<i64: 1, 128>}, {pipeline_mode = #tpu.pipeline_mode<synchronous>, transform_indices = @transform_7, window_bounds = array<i64: 128, 128>}, {pipeline_mode = #tpu.pipeline_mode<synchronous>, transform_indices = @transform_8, window_bounds = array<i64: 1, 128>}, {transform_indices = @transform_9, window_bounds = array<i64: 32, 128>}]} {
    %c0 = arith.constant 0 : index
    %c0_0 = arith.constant 0 : index
    %0 = vector.load %arg1[%c0, %c0_0] : memref<32x128xf32, #tpu.memory_space<vmem>>, vector<32x128xf32>
    %c0_1 = arith.constant 0 : index
    %c0_2 = arith.constant 0 : index
    %1 = vector.load %arg2[%c0_1, %c0_2] : memref<128x128xf32, #tpu.memory_space<vmem>>, vector<128x128xf32>
    %cst = arith.constant dense<0.000000e+00> : vector<32x128xf32>
    %2 = tpu.matmul %0, %1, %cst {dimension_numbers = #tpu.dot_dimension_numbers<[1], [0], [0], [1], [0, 0, 1, 1], [], []>} : vector<32x128xf32>, vector<128x128xf32>, vector<32x128xf32> -> vector<32x128xf32>
    %c0_3 = arith.constant 0 : index
    %c0_4 = arith.constant 0 : index
    %3 = vector.load %arg3[%c0_3, %c0_4] : memref<1x128xf32, #tpu.memory_space<vmem>>, vector<1x128xf32>
    %4 = vector.broadcast %3 : vector<1x128xf32> to vector<32x128xf32>
    %5 = arith.addf %2, %4 : vector<32x128xf32>
    %cst_5 = arith.constant 0.000000e+00 : f32
    %6 = vector.broadcast %cst_5 : f32 to vector<32x128xf32>
    %7 = arith.cmpf ogt, %5, %6 : vector<32x128xf32>
    %cst_6 = arith.constant 1.000000e-01 : f32
    %8 = vector.broadcast %cst_6 : f32 to vector<32x128xf32>
    %9 = arith.mulf %8, %5 : vector<32x128xf32>
    %10 = arith.select %7, %5, %9 : vector<32x128xi1>, vector<32x128xf32>
    %c0_7 = arith.constant 0 : index
    %c0_8 = arith.constant 0 : index
    %11 = vector.load %arg4[%c0_7, %c0_8] : memref<128x128xf32, #tpu.memory_space<vmem>>, vector<128x128xf32>
    %cst_9 = arith.constant dense<0.000000e+00> : vector<32x128xf32>
    %12 = tpu.matmul %10, %11, %cst_9 {dimension_numbers = #tpu.dot_dimension_numbers<[1], [0], [0], [1], [0, 0, 1, 1], [], []>} : vector<32x128xf32>, vector<128x128xf32>, vector<32x128xf32> -> vector<32x128xf32>
    %c0_10 = arith.constant 0 : index
    %c0_11 = arith.constant 0 : index
    %13 = vector.load %arg5[%c0_10, %c0_11] : memref<1x128xf32, #tpu.memory_space<vmem>>, vector<1x128xf32>
    %14 = vector.broadcast %13 : vector<1x128xf32> to vector<32x128xf32>
    %15 = arith.addf %12, %14 : vector<32x128xf32>
    %cst_12 = arith.constant 0.000000e+00 : f32
    %16 = vector.broadcast %cst_12 : f32 to vector<32x128xf32>
    %17 = arith.cmpf ogt, %15, %16 : vector<32x128xf32>
    %cst_13 = arith.constant 1.000000e-01 : f32
    %18 = vector.broadcast %cst_13 : f32 to vector<32x128xf32>
    %19 = arith.mulf %18, %15 : vector<32x128xf32>
    %20 = arith.select %17, %15, %19 : vector<32x128xi1>, vector<32x128xf32>
    %c0_14 = arith.constant 0 : index
    %c0_15 = arith.constant 0 : index
    %21 = vector.load %arg6[%c0_14, %c0_15] : memref<128x128xf32, #tpu.memory_space<vmem>>, vector<128x128xf32>
    %cst_16 = arith.constant dense<0.000000e+00> : vector<32x128xf32>
    %22 = tpu.matmul %20, %21, %cst_16 {dimension_numbers = #tpu.dot_dimension_numbers<[1], [0], [0], [1], [0, 0, 1, 1], [], []>} : vector<32x128xf32>, vector<128x128xf32>, vector<32x128xf32> -> vector<32x128xf32>
    %c0_17 = arith.constant 0 : index
    %c0_18 = arith.constant 0 : index
    %23 = vector.load %arg7[%c0_17, %c0_18] : memref<1x128xf32, #tpu.memory_space<vmem>>, vector<1x128xf32>
    %24 = vector.broadcast %23 : vector<1x128xf32> to vector<32x128xf32>
    %25 = arith.addf %22, %24 : vector<32x128xf32>
    %cst_19 = arith.constant 0.000000e+00 : f32
    %26 = vector.broadcast %cst_19 : f32 to vector<32x128xf32>
    %27 = arith.cmpf ogt, %25, %26 : vector<32x128xf32>
    %cst_20 = arith.constant 1.000000e-01 : f32
    %28 = vector.broadcast %cst_20 : f32 to vector<32x128xf32>
    %29 = arith.mulf %28, %25 : vector<32x128xf32>
    %30 = arith.select %27, %25, %29 : vector<32x128xi1>, vector<32x128xf32>
    %c0_21 = arith.constant 0 : index
    %c0_22 = arith.constant 0 : index
    %31 = vector.load %arg8[%c0_21, %c0_22] : memref<128x128xf32, #tpu.memory_space<vmem>>, vector<128x128xf32>
    %cst_23 = arith.constant dense<0.000000e+00> : vector<32x128xf32>
    %32 = tpu.matmul %30, %31, %cst_23 {dimension_numbers = #tpu.dot_dimension_numbers<[1], [0], [0], [1], [0, 0, 1, 1], [], []>} : vector<32x128xf32>, vector<128x128xf32>, vector<32x128xf32> -> vector<32x128xf32>
    %c0_24 = arith.constant 0 : index
    %c0_25 = arith.constant 0 : index
    %33 = vector.load %arg9[%c0_24, %c0_25] : memref<1x128xf32, #tpu.memory_space<vmem>>, vector<1x128xf32>
    %34 = vector.broadcast %33 : vector<1x128xf32> to vector<32x128xf32>
    %35 = arith.addf %32, %34 : vector<32x128xf32>
    %cst_26 = arith.constant 0.000000e+00 : f32
    %36 = vector.broadcast %cst_26 : f32 to vector<32x128xf32>
    %37 = arith.subf %36, %35 : vector<32x128xf32>
    %38 = math.exp %37 : vector<32x128xf32>
    %cst_27 = arith.constant 1.000000e+00 : f32
    %39 = vector.broadcast %cst_27 : f32 to vector<32x128xf32>
    %40 = arith.addf %39, %38 : vector<32x128xf32>
    %41 = tpu.reciprocal %40 {approx = true} : vector<32x128xf32> -> vector<32x128xf32>
    %c0_28 = arith.constant 0 : index
    %c0_29 = arith.constant 0 : index
    %42 = vector.load %arg10[%c0_28, %c0_29] : memref<32x128xf32, #tpu.memory_space<vmem>>, vector<32x128xf32>
    tpu.vector_store %arg10[%c0_28, %c0_29], %41 {strides = array<i32>} : memref<32x128xf32, #tpu.memory_space<vmem>>, vector<32x128xf32>,
    return
  }
  func.func @transform_0(%arg0: i32) -> (i32, i32) {
    %c0_i32 = arith.constant 0 : i32
    %c0_i32_0 = arith.constant 0 : i32
    return %arg0, %c0_i32 : i32, i32
  }
  func.func @transform_1(%arg0: i32) -> (i32, i32) {
    %c0_i32 = arith.constant 0 : i32
    %c0_i32_0 = arith.constant 0 : i32
    %c0_i32_1 = arith.constant 0 : i32
    return %c0_i32, %c0_i32_0 : i32, i32
  }
  func.func @transform_2(%arg0: i32) -> (i32, i32) {
    %c0_i32 = arith.constant 0 : i32
    %c0_i32_0 = arith.constant 0 : i32
    %c0_i32_1 = arith.constant 0 : i32
    return %c0_i32, %c0_i32_0 : i32, i32
  }
  func.func @transform_3(%arg0: i32) -> (i32, i32) {
    %c0_i32 = arith.constant 0 : i32
    %c0_i32_0 = arith.constant 0 : i32
    %c0_i32_1 = arith.constant 0 : i32
    return %c0_i32, %c0_i32_0 : i32, i32
  }
  func.func @transform_4(%arg0: i32) -> (i32, i32) {
    %c0_i32 = arith.constant 0 : i32
    %c0_i32_0 = arith.constant 0 : i32
    %c0_i32_1 = arith.constant 0 : i32
    return %c0_i32, %c0_i32_0 : i32, i32
  }
  func.func @transform_5(%arg0: i32) -> (i32, i32) {
    %c0_i32 = arith.constant 0 : i32
    %c0_i32_0 = arith.constant 0 : i32
    %c0_i32_1 = arith.constant 0 : i32
    return %c0_i32, %c0_i32_0 : i32, i32
  }
  func.func @transform_6(%arg0: i32) -> (i32, i32) {
    %c0_i32 = arith.constant 0 : i32
    %c0_i32_0 = arith.constant 0 : i32
    %c0_i32_1 = arith.constant 0 : i32
    return %c0_i32, %c0_i32_0 : i32, i32
  }
  func.func @transform_7(%arg0: i32) -> (i32, i32) {
    %c0_i32 = arith.constant 0 : i32
    %c0_i32_0 = arith.constant 0 : i32
    %c0_i32_1 = arith.constant 0 : i32
    return %c0_i32, %c0_i32_0 : i32, i32
  }
  func.func @transform_8(%arg0: i32) -> (i32, i32) {
    %c0_i32 = arith.constant 0 : i32
    %c0_i32_0 = arith.constant 0 : i32
    %c0_i32_1 = arith.constant 0 : i32
    return %c0_i32, %c0_i32_0 : i32, i32
  }
  func.func @transform_9(%arg0: i32) -> (i32, i32) {
    %c0_i32 = arith.constant 0 : i32
    %c0_i32_0 = arith.constant 0 : i32
    return %arg0, %c0_i32 : i32, i32
  }
}

</mosaic_0001>

<bundles_post_ra>
// kernel: tpu_custom_call.1
= control target key start
LH: loop header
LB: loop body
LE: loop exit
PB: predicated region body
PF: predicated region fallthrough
CT: control target
= control target key end

     0   :  { %s2119_s0 = inlined_call_operand.hbm [shape: f32[64,128], index: 0, kind: input, shape index: {}]   ;;  %s2120_s1 = inlined_call_operand.hbm [shape: f32[128,128], index: 1, kind: input, shape index: {}]   ;;  %s2121_s2 = inlined_call_operand.vmem [shape: f32[1,128], index: 2, kind: input, shape index: {}]   ;;  %s2122_s3 = inlined_call_operand.hbm [shape: f32[128,128], index: 3, kind: input, shape index: {}]   ;;  %s2123_s4 = inlined_call_operand.vmem [shape: f32[1,128], index: 4, kind: input, shape index: {}]   ;;  %s2124_s5 = inlined_call_operand.hbm [shape: f32[128,128], index: 5, kind: input, shape index: {}]   ;;  %s2125_s6 = inlined_call_operand.vmem [shape: f32[1,128], index: 6, kind: input, shape index: {}]   ;;  %s2126_s7 = inlined_call_operand.hbm [shape: f32[128,128], index: 7, kind: input, shape index: {}]   ;;  %s2127_s8 = inlined_call_operand.vmem [shape: f32[1,128], index: 8, kind: input, shape index: {}]   ;;  %s2128_s9 = inlined_call_operand.hbm [shape: f32[64,128], index: 9, kind: output, shape index: {}]  }
   0x1   :  { %2135 = sst [smem:[#allocation18_spill]] %s2128_s9 }
   0x2   :  { %14 = vsyncpa [#allocation3], 0 }
   0x3   :  { %16 = vsyncpa [#allocation3 + $0x1], 0 }
   0x4   :  { %17 = vsyncpa [#allocation6], 0 }
   0x5   :  { %18 = vsyncpa [#allocation9], 0 }
   0x6   :  { %19 = vsyncpa [#allocation4], 0 }
   0x7   :  { %21 = vsyncpa [#allocation4 + $0x1], 0  ;;  %s1805_s30 = smov 0   ;;  %s1807_s10 = smov 0  }
   0x8   :  { %s1809_s11 = smov 0   ;;  %s1811_s12 = smov 0  }
   0x9 LB: > { %2136 = sst [smem:[#allocation16_spill]] %s1731_s30  ;;  %s1826_s13 = sadd.s32 4294967295, %s1743_s12   ;;  %s1743_s12 = sphi %s1811_s12, %s2160_s12   ;;  %s1739_s11 = sphi %s1809_s11, %s2159_s11   ;;  %s1735_s10 = sphi %s1807_s10, %s2158_s10   ;;  %s1731_s30 = sphi %s1805_s30, %s2157_s30  }
   0xa   : > { %s1032_s14 = sadd.s32 4294967294, %s1743_s12   ;;  %p47_p0 = scmp.ne.s32.totalorder %s1735_s10, %s1731_s30 }
   0xb   : > { %p2129_p1 = scmp.eq.s32.totalorder %s1826_s13, 0  ;;  %p245_p3 = scmp.eq.s32.totalorder %s1032_s14, 1 }
   0xc   : > { %p1033_p5 = scmp.ge.s32.totalorder %s1743_s12, 1  ;;  %p252_p7 = scmp.lt.s32.totalorder %s1743_s12, 3 }
   0xd   : > { %p1835_p4 = por %p2129_p1, %p47_p0  ;;  %p1840_p6 = por %p245_p3, %p47_p0 }
   0xe   : > { %p1845_p8 = pnand %p1033_p5, %p252_p7  ;;  %s1745_s18 = smov [#allocation5]  }
   0xf   : > { %s2137_s15 = scalar_select %p1835_p4, 1, 0 }
  0x10   : > { %s2138_s16 = scalar_select %p1840_p6, 1, 0 }
  0x11   : > { %s2140_s17 = scalar_select %p1845_p8, 1, 0 }
  0x12   : > { %2139 = sst [smem:[#allocation17_spill]] %s2138_s16  ;;  %s264_s19 = sshll.u32 %s1745_s18, 4  ;;  %s1849_s19 = int_to_ptr.vmem [resolvable:$true] %s264_s19 }
  0x13   : > { %p1440_p9 = pneg %p1845_p8  ;;  %s1746_s21 = smov [#allocation8]  }
  0x14   : > { %s296_s22 = sshll.u32 %s1746_s21, 4  ;;  %s1747_s23 = smov [#allocation7]   ;;  %s1860_s22 = int_to_ptr.vmem [resolvable:$true] %s296_s22 }
  0x15   : > { %p1856_p11 = pnand %p1440_p9, %p2129_p1  ;;  %s1862_s24 = sshll.u32 %s1747_s23, 4  ;;  %s281_s24 = int_to_ptr.vmem [resolvable:$true] %s1862_s24 }
  0x16   : > { %s1527_s27 = scalar_lea.hbm %s2120_s1, 2048 }
  0x17   : > { %p1528_p12 = scmp.ne.s32.totalorder %s2120_s1, %s1527_s27  ;;  %p1872_p13 = pneg %p1856_p11 }
  0x18   : > { %p1534_p5 = scmp.lt.u32.totalorder %s1527_s27, %s2120_s1 }
  0x19   : > { %p1530_p0 = pnand %p1872_p13, %p1528_p12 }
  0x1b   : > { %p1531_p3 = pneg %p1530_p0 }
  0x1d   : > { %p1536_p7 = pnand %p1534_p5, %p1531_p3 }
  0x1f   : > { %1539 = shalt.err (!%p1536_p7)
}
  0x20   : > { %s1540_s23 = scalar_lea.vmem %s1849_s19, 2048  ;;  %p1548_p2 = scmp.lt.s32.totalorder %s1849_s19, %s1849_s19 }
  0x21   : > { %p1541_p9 = scmp.ne.s32.totalorder %s1849_s19, %s1540_s23  ;;  %p1549_p6 = scmp.lt.s32.totalorder %s1540_s23, %s1540_s23 }
  0x23   : > { %p1543_p10 = pnand %p1541_p9, %p1872_p13  ;;  %p1550_p12 = por %p1549_p6, %p1548_p2 }
  0x25   : > { %p1544_p1 = pneg %p1543_p10 }
  0x27   : > { %p1551_p0 = pnand %p1550_p12, %p1544_p1 }
  0x29   : > { %1554 = shalt.err (!%p1551_p0)
}
  0x2a   : > { %s1748_s25 = smov 128   ;;  %s1749_s26 = smov 8  }
  0x2b   : > { %1443 = dma.hbm_to_vmem [thread:$0]  (!%p1856_p11), %s2120_s1, 2048, %s1849_s19, [#allocation6], %s1748_s25, %s1748_s25, %s1749_s26  }
  0x2c   : > { %s1555_s21 = scalar_lea.hbm %s2124_s5, 2048 }
  0x2d   : > { %p1556_p1 = scmp.ne.s32.totalorder %s2124_s5, %s1555_s21  ;;  %p1562_p10 = scmp.lt.u32.totalorder %s1555_s21, %s2124_s5 }
  0x2f   : > { %p1558_p2 = pnand %p1556_p1, %p1872_p13 }
  0x31   : > { %p1559_p6 = pneg %p1558_p2 }
  0x33   : > { %p1564_p3 = pnand %p1562_p10, %p1559_p6 }
  0x35   : > { %1567 = shalt.err (!%p1564_p3)
}
  0x36   : > { %s1568_s19 = scalar_lea.vmem %s1860_s22, 2048  ;;  %p1576_p12 = scmp.lt.s32.totalorder %s1860_s22, %s1860_s22 }
  0x37   : > { %p1569_p5 = scmp.ne.s32.totalorder %s1860_s22, %s1568_s19  ;;  %p1577_p0 = scmp.lt.s32.totalorder %s1568_s19, %s1568_s19 }
  0x39   : > { %p1571_p7 = pnand %p1569_p5, %p1872_p13  ;;  %p1578_p1 = por %p1577_p0, %p1576_p12 }
  0x3b   : > { %p1572_p9 = pneg %p1571_p7 }
  0x3d   : > { %p1579_p2 = pnand %p1578_p1, %p1572_p9 }
  0x3f   : > { %1582 = shalt.err (!%p1579_p2)
}
  0x40   : > { %1449 = dma.hbm_to_vmem [thread:$0]  (!%p1856_p11), %s2124_s5, 2048, %s1860_s22, [#allocation9], %s1748_s25, %s1748_s25, %s1749_s26  }
  0x41   : > { %s1583_s28 = scalar_lea.hbm %s2122_s3, 2048 }
  0x42   : > { %p1584_p6 = scmp.ne.s32.totalorder %s2122_s3, %s1583_s28  ;;  %p1590_p5 = scmp.lt.u32.totalorder %s1583_s28, %s2122_s3 }
  0x44   : > { %p1586_p10 = pnand %p1584_p6, %p1872_p13 }
  0x46   : > { %p1587_p3 = pneg %p1586_p10 }
  0x48   : > { %p1592_p7 = pnand %p1590_p5, %p1587_p3 }
  0x4a   : > { %1595 = shalt.err (!%p1592_p7)
}
  0x4b   : > { %s1596_s19 = scalar_lea.vmem %s281_s24, 2048  ;;  %p1604_p1 = scmp.lt.s32.totalorder %s281_s24, %s281_s24 }
  0x4c   : > { %p1597_p9 = scmp.ne.s32.totalorder %s281_s24, %s1596_s19  ;;  %p1605_p2 = scmp.lt.s32.totalorder %s1596_s19, %s1596_s19 }
  0x4e   : > { %p1599_p12 = pnand %p1597_p9, %p1872_p13  ;;  %p1606_p4 = por %p1605_p2, %p1604_p1 }
  0x50   : > { %p1600_p0 = pneg %p1599_p12 }
  0x52   : > { %p1607_p8 = pnand %p1606_p4, %p1600_p0 }
  0x54   : > { %1610 = shalt.err (!%p1607_p8)
}
  0x55   : > { %1446 = dma.hbm_to_vmem [thread:$0]  (!%p1856_p11), %s2122_s3, 2048, %s281_s24, [#allocation6], %s1748_s25, %s1748_s25, %s1749_s26  }
  0x56   : > { %s1750_s30 = smov [#allocation10]   ;;  %s1611_s29 = scalar_lea.hbm %s2126_s7, 2048 }
  0x57   : > { %s312_s16 = sshll.u32 %s1750_s30, 4  ;;  %p1612_p4 = scmp.ne.s32.totalorder %s2126_s7, %s1611_s29  ;;  %s313_s16 = int_to_ptr.vmem [resolvable:$true] %s312_s16 }
  0x58   : > { %p1618_p10 = scmp.lt.u32.totalorder %s1611_s29, %s2126_s7 }
  0x59   : > { %p1614_p8 = pnand %p1612_p4, %p1872_p13 }
  0x5b   : > { %p1615_p6 = pneg %p1614_p8 }
  0x5d   : > { %p1620_p3 = pnand %p1618_p10, %p1615_p6 }
  0x5f   : > { %1623 = shalt.err (!%p1620_p3)
}
  0x60   : > { %s1624_s24 = scalar_lea.vmem %s313_s16, 2048  ;;  %p1632_p12 = scmp.lt.s32.totalorder %s313_s16, %s313_s16 }
  0x61   : > { %p1625_p5 = scmp.ne.s32.totalorder %s313_s16, %s1624_s24  ;;  %p1633_p0 = scmp.lt.s32.totalorder %s1624_s24, %s1624_s24 }
  0x63   : > { %p1627_p7 = pnand %p1625_p5, %p1872_p13  ;;  %p1634_p1 = por %p1633_p0, %p1632_p12 }
  0x65   : > { %p1628_p9 = pneg %p1627_p7 }
  0x67   : > { %p1635_p2 = pnand %p1634_p1, %p1628_p9 }
  0x69   : > { %1638 = shalt.err (!%p1635_p2)
}
  0x6a   : > { %1452 = dma.hbm_to_vmem [thread:$0]  (!%p1856_p11), %s2126_s7, 2048, %s313_s16, [#allocation9], %s1748_s25, %s1748_s25, %s1749_s26  }
  0x6b   : > { %s1966_s14 = sadd.s32 1, %s1743_s12   ;;  %s34_s20 = sadd.s32 1, %s1739_s11 }
  0x6c   : > { %s31_s30 = ssub.s32 %s1743_s12, %s1966_s14  ;;  %p41_p13 = scmp.ne.s32.totalorder %s1739_s11, %s1735_s10 }
  0x6d   : > { %p32_p4 = scmp.eq.s32.totalorder %s31_s30, 0  ;;  %p42_p8 = scmp.eq.s32.totalorder %s1743_s12, 0 }
  0x6e   : > { %p2143_p6 = scmp.eq.s32.totalorder %s1826_s13, 1  ;;  %p1465_p3 = scmp.lt.s32.totalorder %s1743_s12, 2 }
  0x6f   : > { %s1982_s28 = scalar_select %p32_p4, %s1739_s11, %s34_s20  }
  0x70   : > { %p1976_p10 = por %p2143_p6, %p41_p13  ;;  %p43_p5 = por %p42_p8, %p41_p13 }
  0x71   : > { %s329_s29 = sand.u32 1, %s1739_s11   ;;  %s1058_s16 = sshll.u32 %s1743_s12, 9 }
  0x72   : > { %s1039_s18 = sshll.u32 %s329_s29, 5  ;;  %s1989_s19 = scalar_lea.hbm %s2119_s0, %s1058_s16 }
  0x73   : > { %s333_s24 = scalar_lea.vmem [#allocation2], %s1039_s18  ;;  %p1993_p11 = pnand %p1465_p3, %p43_p5 }
  0x74   : > { %s340_s22 = sshll.u32 %s333_s24, 4  ;;  %s1997_s20 = scalar_lea.sflag [#allocation3], %s329_s29  ;;  %s1991_s22 = int_to_ptr.vmem [resolvable:$true] %s340_s22 }
  0x75   : > { %s1639_s30 = scalar_lea.hbm %s1989_s19, 512  ;;  %p1641_p9 = pneg %p1993_p11 }
  0x76   : > { %p1640_p7 = scmp.ne.s32.totalorder %s1989_s19, %s1639_s30  ;;  %s1644_s21 = scalar_lea.hbm %s2119_s0, 1024 }
  0x77   : > { %p1645_p1 = scmp.lt.u32.totalorder %s1989_s19, %s2119_s0  ;;  %p1646_p2 = scmp.lt.u32.totalorder %s1644_s21, %s1639_s30 }
  0x78   : > { %p1642_p12 = pnand %p1641_p9, %p1640_p7  ;;  %p1648_p4 = scmp.lt.u32.totalorder %s1639_s30, %s1989_s19 }
  0x79   : > { %p1647_p13 = por %p1646_p2, %p1645_p1 }
  0x7a   : > { %p1643_p0 = pneg %p1642_p12 }
  0x7b   : > { %p1649_p8 = por %p1648_p4, %p1647_p13 }
  0x7d   : > { %p1650_p6 = pnand %p1649_p8, %p1643_p0 }
  0x7f   : > { %1653 = shalt.err (!%p1650_p6)
}
  0x80   : > { %s1654_s29 = scalar_lea.vmem %s1991_s22, 512  ;;  %s1751_s18 = smov [#allocation2]  }
  0x81   : > { %p1655_p3 = scmp.ne.s32.totalorder %s1991_s22, %s1654_s29  ;;  %s1659_s16 = sshll.u32 %s1751_s18, 4  ;;  %s1660_s16 = int_to_ptr.vmem [resolvable:$false] %s1659_s16 }
  0x82   : > { %s1661_s23 = scalar_lea.vmem %s1660_s16, 1024  ;;  %p1662_p12 = scmp.lt.s32.totalorder %s1991_s22, %s1660_s16 }
  0x83   : > { %p1657_p5 = pnand %p1655_p3, %p1641_p9  ;;  %p1663_p1 = scmp.lt.s32.totalorder %s1661_s23, %s1654_s29 }
  0x85   : > { %p1658_p7 = pneg %p1657_p5  ;;  %p1664_p2 = por %p1663_p1, %p1662_p12 }
  0x87   : > { %p1665_p13 = pnand %p1664_p2, %p1658_p7 }
  0x89   : > { %1668 = shalt.err (!%p1665_p13)
}
  0x8a   : > { %1456 = dma.hbm_to_vmem [thread:$0]  (!%p1993_p11), %s1989_s19, 512, %s1991_s22, %s1997_s20, %s1748_s25, %s1748_s25, %s1749_s26  }
  0x8b   : > { %p2146_p9 = scmp.ne.s32.totalorder %s2140_s17, 0 }
  0x8c   : > { %s2031_s30 = sand.u32 (!%p2146_p9), 1, %s1735_s10   ;;  %p2147_p0 = scmp.ne.s32.totalorder (!%p2146_p9), %s2137_s15, 0 }
  0x8d   : > { %352 = sbr.rel (%p2146_p9) target bundleno = 1110 (0x456), region = 56  ;;  %s1043_s21 = sshll.u32 (!%p2146_p9), %s2031_s30, 5 }
  0x8e   : > { %s355_s24 = scalar_lea.sflag (!%p2146_p9), [#allocation3], %s2031_s30  ;;  %s2037_s9 = scalar_lea.vmem (!%p2146_p9), [#allocation2], %s1043_s21 }
  0x94   : > { %1714 = dma.done.wait (%p2147_p0), %s355_s24, 512  }
  0x95   : > { %1716 = vsyncadd (%p2147_p0), %s355_s24, 4294966784  ;;  %p2148_p11 = scmp.eq.s32.totalorder %s1826_s13, 0 }
  0x97   : > { %1718 = dma.done.wait (%p2148_p11), [#allocation6], 4096   ;;  %p2149_p4 = pmov %p2148_p11 }
  0x99   : > { %1720 = vsyncadd (%p2149_p4), [#allocation6], 4294963200  ;;  %p2150_p8 = pmov %p2149_p4 }
  0x9a   : > { %p2151_p6 = pmov %p2149_p4 }
  0x9b   : > { %1722 = dma.done.wait (%p2150_p8), [#allocation9], 4096  }
  0x9c   : > { %1724 = vsyncadd (%p2151_p6), [#allocation9], 4294963200  ;;  %v415_v0 = vld [vmem:[#allocation5] sm:$0xff]  ;;  %v416_v1 = vld [vmem:[#allocation5 + $0x8] sm:$0xff]  ;;  %s1059_s18 = sshll.u32 %s1826_s13, 9  ;;  %s408_s16 = scalar_lea.vmem [#allocation11], %s1043_s21 }
  0x9d   : > { %v417_v2 = vld [vmem:[#allocation5 + $0x10] sm:$0xff]  ;;  %v1292_v3 = vpack.c.bf16 %v416_v1, %v415_v0  ;;  %v418_v4 = vld [vmem:[#allocation5 + $0x18] sm:$0xff]  ;;  %v419_v6 = vld [vmem:[#allocation5 + $0x20] sm:$0xff]  ;;  %s921_s23 = sshll.u32 %s408_s16, 4  ;;  %s2152_s15 = sld [smem:[#allocation18_spill]]  ;;  %s2075_s23 = int_to_ptr.vmem [resolvable:$true] %s921_s23 }
  0x9e   : > { %v1296_v5 = vpack.c.bf16 %v418_v4, %v417_v2  ;;  %v420_v7 = vld [vmem:[#allocation5 + $0x28] sm:$0xff]  ;;  %v411_v9 = vld [vmem:[%s2037_s9] sm:$0xff]  ;;  %v421_v10 = vld [vmem:[#allocation5 + $0x30] sm:$0xff]  ;;  %s908_s13 = scalar_lea.sflag [#allocation4], %s2031_s30  ;;  %s1669_s21 = scalar_lea.vmem %s2075_s23, 512 }
  0x9f   : > { %1293 = vmatprep.subr.bf16.mxu0 %v1292_v3  ;;  %v1300_v8 = vpack.c.bf16 %v420_v7, %v419_v6  ;;  %v422_v11 = vld [vmem:[#allocation5 + $0x38] sm:$0xff]  ;;  %1172 = vmatprep.mubr.f32.mxu0 %v411_v9  ;;  %v535_v12 = vld [vmem:[#allocation7] sm:$0xff]  ;;  %v536_v13 = vld [vmem:[#allocation7 + $0x8] sm:$0xff]  ;;  %p1670_p3 = scmp.ne.s32.totalorder %s2075_s23, %s1669_s21  ;;  %s1752_s25 = smov [#allocation11]  }
  0xa0   : > { %1295 = vmatpush3.bf16.msra.mxu0 %v1292_v3  ;;  %v537_v14 = vld [vmem:[#allocation7 + $0x10] sm:$0xff]  ;;  %v538_v15 = vld [vmem:[#allocation7 + $0x18] sm:$0xff]  ;;  %v1324_v16 = vpack.c.bf16 %v536_v13, %v535_v12  ;;  %v1304_v18 = vpack.c.bf16 %v422_v11, %v421_v10  ;;  %v539_v19 = vld [vmem:[#allocation7 + $0x20] sm:$0xff]  ;;  %s1673_s26 = sshll.u32 %s1752_s25, 4  ;;  %s1674_s26 = int_to_ptr.vmem [resolvable:$false] %s1673_s26 }
  0xa1   : > { %1297 = vmatprep.subr.bf16.mxu0 %v1296_v5  ;;  %v1328_v17 = vpack.c.bf16 %v538_v15, %v537_v14  ;;  %v540_v20 = vld [vmem:[#allocation7 + $0x28] sm:$0xff]  ;;  %v423_v21 = vld [vmem:[#allocation5 + $0x40] sm:$0xff]  ;;  %v541_v25 = vld [vmem:[#allocation7 + $0x30] sm:$0xff]  ;;  %p1671_p5 = pnand %p1670_p3, %p1976_p10  ;;  %s1675_s19 = scalar_lea.vmem %s1674_s26, 1024 }
  0xa2   : > { %v424_v22 = vld [vmem:[#allocation5 + $0x48] sm:$0xff]  ;;  %1325 = vmatprep.subr.bf16.mxu1 %v1324_v16  ;;  %v1332_v23 = vpack.c.bf16 %v540_v20, %v539_v19  ;;  %v542_v26 = vld [vmem:[#allocation7 + $0x38] sm:$0xff]  ;;  %v425_v27 = vld [vmem:[#allocation5 + $0x50] sm:$0xff]  ;;  %p1676_p12 = scmp.lt.s32.totalorder %s2075_s23, %s1674_s26  ;;  %p1677_p1 = scmp.lt.s32.totalorder %s1675_s19, %s1669_s21 }
  0xa3   : > { %1327 = vmatpush3.bf16.msra.mxu1 %v1324_v16  ;;  %v1308_v24 = vpack.c.bf16 %v424_v22, %v423_v21  ;;  %v426_v28 = vld [vmem:[#allocation5 + $0x58] sm:$0xff]  ;;  %v1336_v29 = vpack.c.bf16 %v542_v26, %v541_v25  ;;  %v543_v31 = vld [vmem:[#allocation7 + $0x40] sm:$0xff]  ;;  %v544_v32 = vld [vmem:[#allocation7 + $0x48] sm:$0xff]  ;;  %s2073_s17 = scalar_lea.hbm %s2152_s15, %s1059_s18  ;;  %p1672_p7 = pneg %p1671_p5 }
  0xa4   : > { %1299 = vmatpush3.bf16.msra.mxu0 %v1296_v5  ;;  %1329 = vmatprep.subr.bf16.mxu1 %v1328_v17  ;;  %v1312_v30 = vpack.c.bf16 %v426_v28, %v425_v27  ;;  %v427_v33 = vld [vmem:[#allocation5 + $0x60] sm:$0xff]  ;;  %v428_v34 = vld [vmem:[#allocation5 + $0x68] sm:$0xff]  ;;  %v1340_v35 = vpack.c.bf16 %v544_v32, %v543_v31  ;;  %v545_v37 = vld [vmem:[#allocation7 + $0x50] sm:$0xff]  ;;  %p1678_p2 = por %p1677_p1, %p1676_p12 }
  0xa5   : > { %1301 = vmatprep.subr.bf16.mxu0 %v1300_v8  ;;  %v1316_v36 = vpack.c.bf16 %v428_v34, %v427_v33  ;;  %v546_v38 = vld [vmem:[#allocation7 + $0x58] sm:$0xff]  ;;  %v429_v39 = vld [vmem:[#allocation5 + $0x70] sm:$0xff]  ;;  %v412_v43 = vld [vmem:[%s2037_s9 + $0x8] sm:$0xff] }
  0xa6   : > { %v430_v40 = vld [vmem:[#allocation5 + $0x78] sm:$0xff]  ;;  %v1344_v41 = vpack.c.bf16 %v546_v38, %v545_v37  ;;  %v413_v44 = vld [vmem:[%s2037_s9 + $0x10] sm:$0xff]  ;;  %v547_v46 = vld [vmem:[#allocation7 + $0x60] sm:$0xff]  ;;  %p1679_p13 = pnand %p1678_p2, %p1672_p7 }
  0xa7   : > { %1331 = vmatpush3.bf16.msra.mxu1 %v1328_v17  ;;  %v1320_v42 = vpack.c.bf16 %v430_v40, %v429_v39  ;;  %v414_v45 = vld [vmem:[%s2037_s9 + $0x18] sm:$0xff]  ;;  %v548_v47 = vld [vmem:[#allocation7 + $0x68] sm:$0xff]  ;;  %v549_v49 = vld [vmem:[#allocation7 + $0x70] sm:$0xff] }
  0xa8   : > { %1303 = vmatpush3.bf16.msra.mxu0 %v1300_v8  ;;  %1333 = vmatprep.subr.bf16.mxu1 %v1332_v23  ;;  %v1348_v48 = vpack.c.bf16 %v548_v47, %v547_v46  ;;  %v550_v50 = vld [vmem:[#allocation7 + $0x78] sm:$0xff]  ;;  %v655_v52 = vld [vmem:[#allocation8] sm:$0xff]  ;;  %v656_v53 = vld [vmem:[#allocation8 + $0x8] sm:$0xff] }
  0xa9   : > { %1305 = vmatprep.subr.bf16.mxu0 %v1304_v18  ;;  %v1352_v51 = vpack.c.bf16 %v550_v50, %v549_v49  ;;  %v657_v54 = vld [vmem:[#allocation8 + $0x10] sm:$0xff]  ;;  %v1356_v55 = vpack.c.bf16 %v656_v53, %v655_v52  ;;  %v658_v56 = vld [vmem:[#allocation8 + $0x18] sm:$0xff]  ;;  %v659_v58 = vld [vmem:[#allocation8 + $0x20] sm:$0xff] }
  0xaa   : > { %v1360_v57 = vpack.c.bf16 %v658_v56, %v657_v54  ;;  %v660_v59 = vld [vmem:[#allocation8 + $0x28] sm:$0xff]  ;;  %v661_v61 = vld [vmem:[#allocation8 + $0x30] sm:$0xff]  ;;  %v662_v62 = vld [vmem:[#allocation8 + $0x38] sm:$0xff] }
  0xab   : > { %1335 = vmatpush3.bf16.msra.mxu1 %v1332_v23  ;;  %v1364_v60 = vpack.c.bf16 %v660_v59, %v659_v58  ;;  %v1368_v63 = vpack.c.bf16 %v662_v62, %v661_v61  ;;  %v663_v0 = vld [vmem:[#allocation8 + $0x40] sm:$0xff]  ;;  %v664_v1 = vld [vmem:[#allocation8 + $0x48] sm:$0xff]  ;;  %v665_v3 = vld [vmem:[#allocation8 + $0x50] sm:$0xff] }
  0xac   : > { %1307 = vmatpush3.bf16.msra.mxu0 %v1304_v18  ;;  %1337 = vmatprep.subr.bf16.mxu1 %v1336_v29  ;;  %v1372_v2 = vpack.c.bf16 %v664_v1, %v663_v0  ;;  %v666_v4 = vld [vmem:[#allocation8 + $0x58] sm:$0xff]  ;;  %v1049_v6 = vld [vmem:[%s2121_s2] ss:$0 sm:$0xff]  ;;  %v669_v26 = vld [vmem:[#allocation8 + $0x70] sm:$0xff] }
  0xad   : > { %1309 = vmatprep.subr.bf16.mxu0 %v1308_v24  ;;  %v1376_v5 = vpack.c.bf16 %v666_v4, %v665_v3  ;;  %v667_v23 = vld [vmem:[#allocation8 + $0x60] sm:$0xff]  ;;  %v670_v27 = vld [vmem:[#allocation8 + $0x78] sm:$0xff]  ;;  %v777_v31 = vld [vmem:[#allocation10 + $0x10] sm:$0xff] }
  0xae   : > { %v1384_v28 = vpack.c.bf16 %v670_v27, %v669_v26  ;;  %v778_v33 = vld [vmem:[#allocation10 + $0x18] sm:$0xff]  ;;  %v781_v38 = vld [vmem:[#allocation10 + $0x30] sm:$0xff]  ;;  %v1050_v47 = vld [vmem:[%s2123_s4] ss:$0 sm:$0xff] }
  0xaf   : > { %1339 = vmatpush3.bf16.msra.mxu1 %v1336_v29  ;;  %v775_v29 = vld [vmem:[#allocation10] sm:$0xff]  ;;  %v1392_v34 = vpack.c.bf16 %v778_v33, %v777_v31  ;;  %v782_v39 = vld [vmem:[#allocation10 + $0x38] sm:$0xff]  ;;  %v788_v1 = vld [vmem:[#allocation10 + $0x68] sm:$0xff] }
  0xb0   : > { %1311 = vmatpush3.bf16.msra.mxu0 %v1308_v24  ;;  %1341 = vmatprep.subr.bf16.mxu1 %v1340_v35  ;;  %v668_v24 = vld [vmem:[#allocation8 + $0x68] sm:$0xff]  ;;  %v1400_v40 = vpack.c.bf16 %v782_v39, %v781_v38  ;;  %v787_v0 = vld [vmem:[#allocation10 + $0x60] sm:$0xff]  ;;  %v789_v3 = vld [vmem:[#allocation10 + $0x70] sm:$0xff] }
  0xb1   : > { %1313 = vmatprep.subr.bf16.mxu0 %v1312_v30  ;;  %v1380_v25 = vpack.c.bf16 %v668_v24, %v667_v23  ;;  %v790_v4 = vld [vmem:[#allocation10 + $0x78] sm:$0xff]  ;;  %v1052_v23 = vld [vmem:[%s2127_s8] ss:$0 sm:$0xff] }
  0xb3   : > { %1343 = vmatpush3.bf16.msra.mxu1 %v1340_v35  ;;  %v779_v35 = vld [vmem:[#allocation10 + $0x20] sm:$0xff] }
  0xb4   : > { %1315 = vmatpush3.bf16.msra.mxu0 %v1312_v30  ;;  %1345 = vmatprep.subr.bf16.mxu1 %v1344_v41  ;;  %v776_v30 = vld [vmem:[#allocation10 + $0x8] sm:$0xff] }
  0xb5   : > { %1317 = vmatprep.subr.bf16.mxu0 %v1316_v36  ;;  %v1388_v32 = vpack.c.bf16 %v776_v30, %v775_v29 }
  0xb7   : > { %1347 = vmatpush3.bf16.msra.mxu1 %v1344_v41  ;;  %v783_v41 = vld [vmem:[#allocation10 + $0x40] sm:$0xff] }
  0xb8   : > { %1319 = vmatpush3.bf16.msra.mxu0 %v1316_v36  ;;  %1349 = vmatprep.subr.bf16.mxu1 %v1348_v48  ;;  %v780_v36 = vld [vmem:[#allocation10 + $0x28] sm:$0xff] }
  0xb9   : > { %1321 = vmatprep.subr.bf16.mxu0 %v1320_v42  ;;  %v1396_v37 = vpack.c.bf16 %v780_v36, %v779_v35 }
  0xbb   : > { %1351 = vmatpush3.bf16.msra.mxu1 %v1348_v48 }
  0xbc   : > { %1323 = vmatpush3.bf16.msra.mxu0 %v1320_v42  ;;  %1353 = vmatprep.subr.bf16.mxu1 %v1352_v51  ;;  %v784_v42 = vld [vmem:[#allocation10 + $0x48] sm:$0xff] }
  0xbd   : > { %1357 = vmatprep.subr.bf16.mxu0 %v1356_v55 }
  0xbf   : > { %1173 = vmatmul.mubr.f32.vlgmr.msra.gmra.mrb[0].mxu0 %v412_v43  ;;  %1355 = vmatpush3.bf16.msra.mxu1 %v1352_v51  ;;  %v1404_v43 = vpack.c.bf16 %v784_v42, %v783_v41 }
  0xc0   : > { %1175 = vmatprep.mubr.f32.mxu0 %v413_v44  ;;  %1359 = vmatpush3.bf16.msra.mxu0 %v1356_v55  ;;  %v785_v44 = vld [vmem:[#allocation10 + $0x50] sm:$0xff] }
  0xc1   : > { %1361 = vmatprep.subr.bf16.mxu0 %v1360_v57  ;;  %1389 = vmatprep.subr.bf16.mxu1 %v1388_v32 }
  0xc3   : > { %1176 = vmatmul.mubr.f32.gmra.mrb[2].mxu0 %v414_v45  ;;  %v786_v45 = vld [vmem:[#allocation10 + $0x58] sm:$0xff] }
  0xc4   : > { %1363 = vmatpush3.bf16.msra.mxu0 %v1360_v57  ;;  %v1408_v46 = vpack.c.bf16 %v786_v45, %v785_v44 }
  0xc5   : > { %1365 = vmatprep.subr.bf16.mxu0 %v1364_v60 }
  0xc8   : > { %1367 = vmatpush3.bf16.msra.mxu0 %v1364_v60 }
  0xc9   : > { %1369 = vmatprep.subr.bf16.mxu0 %v1368_v63 }
  0xcc   : > { %1371 = vmatpush3.bf16.msra.mxu0 %v1368_v63 }
  0xcd   : > { %1373 = vmatprep.subr.bf16.mxu0 %v1372_v2 }
  0xd0   : > { %1375 = vmatpush3.bf16.msra.mxu0 %v1372_v2  ;;  %v1412_v2 = vpack.c.bf16 %v788_v1, %v787_v0 }
  0xd1   : > { %1377 = vmatprep.subr.bf16.mxu0 %v1376_v5 }
  0xd4   : > { %1379 = vmatpush3.bf16.msra.mxu0 %v1376_v5  ;;  %v1416_v5 = vpack.c.bf16 %v790_v4, %v789_v3 }
  0xd5   : > { %1381 = vmatprep.subr.bf16.mxu0 %v1380_v25 }
  0xd8   : > { %1383 = vmatpush3.bf16.msra.mxu0 %v1380_v25 }
  0xd9   : > { %1385 = vmatprep.subr.bf16.mxu0 %v1384_v28 }
  0xdc   : > { %1387 = vmatpush3.bf16.msra.mxu0 %v1384_v28 }
 0x192   : > { %v1174_v7 = vpop.f32.mrb[0].mxu0 }
 0x193   : > { %v510_v8 = vadd.f32 %v1174_v7, %v1049_v6  ;;  %v504_v9 = vpop.f32.mrb[1].mxu0 }
 0x194   : > { %v505_v10 = vadd.f32 %v1049_v6, %v504_v9 }
 0x195   : > { %v528_v11 = vmul.f32 0.1, %v510_v8  ;;  %vm524_vm1 = vcmp.gt.f32.partialorder %v510_v8, 0.0 }
 0x196   : > { %v1177_v12 = vpop.f32.mrb[2].mxu0  ;;  %vm523_vm0 = vcmp.gt.f32.partialorder %v505_v10, 0.0  ;;  %v527_v13 = vmul.f32 0.1, %v505_v10 }
 0x197   : > { %v520_v14 = vadd.f32 %v1177_v12, %v1049_v6  ;;  %v514_v15 = vpop.f32.mrb[3].mxu0  ;;  %v532_v19 = vsel %vm524_vm1, %v510_v8, %v528_v11 }
 0x198   : > { %v515_v16 = vadd.f32 %v1049_v6, %v514_v15  ;;  %v531_v17 = vsel %vm523_vm0, %v505_v10, %v527_v13  ;;  %v1051_v6 = vld [vmem:[%s2125_s6] ss:$0 sm:$0xff] }
 0x199   : > { %v530_v18 = vmul.f32 0.1, %v520_v14  ;;  %1210 = vmatprep.mubr.f32.mxu1 %v531_v17  ;;  %vm526_vm3 = vcmp.gt.f32.partialorder %v520_v14, 0.0 }
 0x19a   : > { %v529_v20 = vmul.f32 0.1, %v515_v16  ;;  %1211 = vmatmul.mubr.f32.vlgmr.msra.gmra.mrb[0].mxu1 %v532_v19  ;;  %vm525_vm2 = vcmp.gt.f32.partialorder %v515_v16, 0.0 }
 0x19b   : > { %v534_v22 = vsel %vm526_vm3, %v520_v14, %v530_v18  ;;  %1391 = vmatpush3.bf16.msra.mxu1 %v1388_v32 }
 0x19c   : > { %v533_v21 = vsel %vm525_vm2, %v515_v16, %v529_v20  ;;  %1393 = vmatprep.subr.bf16.mxu1 %v1392_v34 }
 0x19d   : > { %1213 = vmatprep.mubr.f32.mxu1 %v533_v21 }
 0x19e   : > { %1214 = vmatmul.mubr.f32.gmra.mrb[2].mxu1 %v534_v22 }
 0x19f   : > { %1395 = vmatpush3.bf16.msra.mxu1 %v1392_v34 }
 0x1a0   : > { %1397 = vmatprep.subr.bf16.mxu1 %v1396_v37 }
 0x1a3   : > { %1399 = vmatpush3.bf16.msra.mxu1 %v1396_v37 }
 0x1a4   : > { %1401 = vmatprep.subr.bf16.mxu1 %v1400_v40 }
 0x1a7   : > { %1403 = vmatpush3.bf16.msra.mxu1 %v1400_v40 }
 0x1a8   : > { %1405 = vmatprep.subr.bf16.mxu1 %v1404_v43 }
 0x1ab   : > { %1407 = vmatpush3.bf16.msra.mxu1 %v1404_v43 }
 0x1ac   : > { %1409 = vmatprep.subr.bf16.mxu1 %v1408_v46 }
 0x1af   : > { %1411 = vmatpush3.bf16.msra.mxu1 %v1408_v46 }
 0x1b0   : > { %1413 = vmatprep.subr.bf16.mxu1 %v1412_v2 }
 0x1b3   : > { %1415 = vmatpush3.bf16.msra.mxu1 %v1412_v2 }
 0x1b4   : > { %1417 = vmatprep.subr.bf16.mxu1 %v1416_v5 }
 0x1b7   : > { %1419 = vmatpush3.bf16.msra.mxu1 %v1416_v5 }
 0x26d   : > { %v1212_v48 = vpop.f32.mrb[0].mxu1 }
 0x26e   : > { %v630_v49 = vadd.f32 %v1212_v48, %v1050_v47  ;;  %v624_v50 = vpop.f32.mrb[1].mxu1 }
 0x26f   : > { %v625_v51 = vadd.f32 %v1050_v47, %v624_v50 }
 0x270   : > { %v648_v52 = vmul.f32 0.1, %v630_v49  ;;  %vm644_vm4 = vcmp.gt.f32.partialorder %v630_v49, 0.0 }
 0x271   : > { %v647_v53 = vmul.f32 0.1, %v625_v51  ;;  %v1215_v54 = vpop.f32.mrb[2].mxu1  ;;  %vm643_vm5 = vcmp.gt.f32.partialorder %v625_v51, 0.0 }
 0x272   : > { %v640_v55 = vadd.f32 %v1215_v54, %v1050_v47  ;;  %v634_v56 = vpop.f32.mrb[3].mxu1  ;;  %v652_v59 = vsel %vm644_vm4, %v630_v49, %v648_v52 }
 0x273   : > { %v635_v57 = vadd.f32 %v1050_v47, %v634_v56  ;;  %v651_v58 = vsel %vm643_vm5, %v625_v51, %v647_v53 }
 0x274   : > { %v650_v60 = vmul.f32 0.1, %v640_v55  ;;  %1248 = vmatprep.mubr.f32.mxu0 %v651_v58  ;;  %vm646_vm7 = vcmp.gt.f32.partialorder %v640_v55, 0.0 }
 0x275   : > { %v649_v61 = vmul.f32 0.1, %v635_v57  ;;  %1249 = vmatmul.mubr.f32.vlgmr.msra.gmra.mrb[4].mxu0 %v652_v59  ;;  %vm645_vm6 = vcmp.gt.f32.partialorder %v635_v57, 0.0 }
 0x276   : > { %v654_v63 = vsel %vm646_vm7, %v640_v55, %v650_v60 }
 0x277   : > { %v653_v62 = vsel %vm645_vm6, %v635_v57, %v649_v61 }
 0x278   : > { %1251 = vmatprep.mubr.f32.mxu0 %v653_v62 }
 0x279   : > { %1252 = vmatmul.mubr.f32.gmra.mrb[6].mxu0 %v654_v63 }
 0x348   : > { %v1250_v7 = vpop.f32.mrb[4].mxu0 }
 0x349   : > { %v750_v8 = vadd.f32 %v1250_v7, %v1051_v6  ;;  %v744_v9 = vpop.f32.mrb[5].mxu0 }
 0x34a   : > { %v745_v10 = vadd.f32 %v1051_v6, %v744_v9 }
 0x34b   : > { %v768_v11 = vmul.f32 0.1, %v750_v8  ;;  %vm764_vm8 = vcmp.gt.f32.partialorder %v750_v8, 0.0 }
 0x34c   : > { %v767_v12 = vmul.f32 0.1, %v745_v10  ;;  %v1253_v13 = vpop.f32.mrb[6].mxu0  ;;  %vm763_vm9 = vcmp.gt.f32.partialorder %v745_v10, 0.0 }
 0x34d   : > { %v760_v14 = vadd.f32 %v1253_v13, %v1051_v6  ;;  %v754_v15 = vpop.f32.mrb[7].mxu0  ;;  %v772_v18 = vsel %vm764_vm8, %v750_v8, %v768_v11 }
 0x34e   : > { %v755_v16 = vadd.f32 %v1051_v6, %v754_v15  ;;  %v771_v17 = vsel %vm763_vm9, %v745_v10, %v767_v12 }
 0x34f   : > { %v770_v19 = vmul.f32 0.1, %v760_v14  ;;  %1286 = vmatprep.mubr.f32.mxu1 %v771_v17  ;;  %vm766_vm11 = vcmp.gt.f32.partialorder %v760_v14, 0.0 }
 0x350   : > { %v769_v20 = vmul.f32 0.1, %v755_v16  ;;  %1287 = vmatmul.mubr.f32.vlgmr.msra.gmra.mrb[4].mxu1 %v772_v18  ;;  %vm765_vm10 = vcmp.gt.f32.partialorder %v755_v16, 0.0 }
 0x351   : > { %v774_v22 = vsel %vm766_vm11, %v760_v14, %v770_v19 }
 0x352   : > { %v773_v21 = vsel %vm765_vm10, %v755_v16, %v769_v20 }
 0x353   : > { %1289 = vmatprep.mubr.f32.mxu1 %v773_v21 }
 0x354   : > { %1290 = vmatmul.mubr.f32.gmra.mrb[6].mxu1 %v774_v22 }
 0x423   : > { %v1288_v24 = vpop.f32.mrb[4].mxu1 }
 0x424   : > { %v870_v25 = vadd.f32 %v1288_v24, %v1052_v23  ;;  %v864_v26 = vpop.f32.mrb[5].mxu1 }
 0x425   : > { %v865_v27 = vadd.f32 %v1052_v23, %v864_v26 }
 0x426   : > { %v884_v28 = vsub.f32 0.0, %v870_v25 }
 0x427   : > { %v883_v29 = vsub.f32 0.0, %v865_v27  ;;  %v1291_v30 = vpop.f32.mrb[6].mxu1 }
 0x428   : > { %v889_v31 = vmul.f32 1.442695, %v884_v28  ;;  %v880_v32 = vadd.f32 %v1291_v30, %v1052_v23  ;;  %v874_v33 = vpop.f32.mrb[7].mxu1 }
 0x429   : > { %v887_v34 = vmul.f32 1.442695, %v883_v29  ;;  %v875_v35 = vadd.f32 %v1052_v23, %v874_v33 }
 0x42a   : > { %1511 = vpow2.f32 %v889_v31  ;;  %v886_v36 = vsub.f32 0.0, %v880_v32 }
 0x42b   : > { %1513 = vpow2.f32 %v887_v34  ;;  %v885_v37 = vsub.f32 0.0, %v875_v35 }
 0x42c   : > { %v893_v38 = vmul.f32 1.442695, %v886_v36 }
 0x42d   : > { %v891_v39 = vmul.f32 1.442695, %v885_v37 }
 0x42e   : > { %1515 = vpow2.f32 %v893_v38 }
 0x42f   : > { %1517 = vpow2.f32 %v891_v39 }
 0x434   : > { %v1512_v40 = vpop.eup %1511 }
 0x435   : > { %v1514_v41 = vpop.eup %1513  ;;  %v896_v42 = vadd.f32 1.0, %v1512_v40 }
 0x436   : > { %v895_v43 = vadd.f32 1.0, %v1514_v41 }
 0x437   : > { %1519 = vrcp.f32 %v896_v42 }
 0x438   : > { %v1516_v44 = vpop.eup %1515  ;;  %1521 = vrcp.f32 %v895_v43 }
 0x439   : > { %v1518_v45 = vpop.eup %1517  ;;  %v898_v46 = vadd.f32 1.0, %v1516_v44 }
 0x43a   : > { %v897_v47 = vadd.f32 1.0, %v1518_v45 }
 0x43b   : > { %1523 = vrcp.f32 %v898_v46 }
 0x43c   : > { %1525 = vrcp.f32 %v897_v47 }
 0x441   : > { %v1520_v48 = vpop.eup %1519 }
 0x442   : > { %v1522_v49 = vpop.eup %1521  ;;  %904 = vst [vmem:[%s408_s16 + $0x8] sm:$0xff] %v1520_v48 }
 0x443   : > { %903 = vst [vmem:[%s408_s16] sm:$0xff] %v1522_v49 }
 0x445   : > { %v1524_v50 = vpop.eup %1523 }
 0x446   : > { %v1526_v51 = vpop.eup %1525  ;;  %906 = vst [vmem:[%s408_s16 + $0x18] sm:$0xff] %v1524_v50 }
 0x447   : > { %905 = vst [vmem:[%s408_s16 + $0x10] sm:$0xff] %v1526_v51 }
 0x448   : > { %1682 = shalt.err (!%p1679_p13)
}
 0x449   : > { %s1683_s22 = scalar_lea.hbm %s2073_s17, 512  ;;  %s1687_s18 = scalar_lea.hbm %s2152_s15, 1024 }
 0x44a   : > { %p1684_p9 = scmp.ne.s32.totalorder %s2073_s17, %s1683_s22  ;;  %p1688_p4 = scmp.lt.u32.totalorder %s2073_s17, %s2152_s15 }
 0x44b   : > { %p1689_p8 = scmp.lt.u32.totalorder %s1687_s18, %s1683_s22  ;;  %p1691_p3 = scmp.lt.u32.totalorder %s1683_s22, %s2073_s17 }
 0x44c   : > { %p1685_p0 = pnand %p1684_p9, %p1976_p10 }
 0x44d   : > { %p1690_p6 = por %p1689_p8, %p1688_p4 }
 0x44e   : > { %p1686_p11 = pneg %p1685_p0 }
 0x44f   : > { %p1692_p5 = por %p1691_p3, %p1690_p6 }
 0x451   : > { %p1693_p7 = pnand %p1692_p5, %p1686_p11 }
 0x453   : > { %1696 = shalt.err (!%p1693_p7)
}
 0x454   : > { %s1753_s9 = smov 128   ;;  %s1754_s21 = smov 8  }
 0x455   : > { %1438 = dma.vmem_to_hbm [thread:$0]  (%p1976_p10), %s2075_s23, 512, %s2073_s17, %s908_s13, %s1753_s9, %s1753_s9, %s1754_s21  }
 0x456 PF: > { %s2153_s25 = sld [smem:[#allocation16_spill]]  ;;  %s2154_s26 = sld [smem:[#allocation17_spill]] }
 0x457   : > { %p2156_p1 = scmp.ge.s32.totalorder %s1743_s12, 2 }
 0x45c   : > { %s936_s19 = sand.u32 1, %s2153_s25   ;;  %p2155_p12 = scmp.ne.s32.totalorder %s2154_s26, 0 }
 0x45d   : > { %s937_s22 = scalar_lea.sflag [#allocation4], %s936_s19 }
 0x45e   : > { %p1458_p2 = pnand %p2156_p1, %p2155_p12 }
 0x460   : > { %1726 = dma.done.wait (!%p1458_p2), %s937_s22, 512  }
 0x461   : > { %1728 = vsyncadd (!%p1458_p2), %s937_s22, 4294966784  ;;  %p24_p13 = scmp.ge.s32.totalorder %s1966_s14, 4   ;;  %s2157_s30 = smov %s1735_s10 }
 0x462   : > { %s2158_s10 = smov %s1739_s11  ;;  %s2159_s11 = smov %s1982_s28 }
 0x463   : > { %s2160_s12 = smov %s1966_s14  ;;  %26 = sbr.rel (!%p24_p13) target bundleno = 9 (0x9), region = 117 }
 0x46a   :  { %942 = vsyncpa [#allocation3], 1 }
 0x46b   :  { %944 = vsyncpa [#allocation3 + $0x1], 1 }
 0x46c   :  { %945 = vsyncpa [#allocation6], 1 }
 0x46d   :  { %946 = vsyncpa [#allocation9], 1 }
 0x46e   :  { %947 = vsyncpa [#allocation4], 1 }
 0x46f   :  { %949 = vsyncpa [#allocation4 + $0x1], 1 }

</bundles_post_ra>
